<compile_context>
chip_gen: v5e
topology: v5e:2x2
jax: 0.10.0
libtpu: 0.0.40
codegen_flags: <defaults>
</compile_context>

<pallas_src>
import functools

import jax
import jax.numpy as jnp
from jax.experimental import pallas as pl
from jax.experimental.pallas import tpu as pltpu


FEAT_IN = 3            # self.feat_in
HIDDEN = 128           # MLP hidden width
OUT_DIM = FEAT_IN * 2  # 6
OUT_PAD = 8            # merged (offset | mul | zero-pad) output lanes


class Config:
    appearance_embedding_dim = 32
    appearance_n_fourier_freqs = 4
    app_per_gauss = True
    app_per_gauss_bg = True


def _round_up(x, m):
    return ((x + m - 1) // m) * m


def _is_multi_tensorcore_chip():
    """True when the chip has >1 TensorCore per chip (v4/v5p/v7x style);
    single-TC inference chips (v5e/v6e) return False.  Unknown -> True
    (keeping a few extra parallel grid steps is harmless)."""
    try:
        kind = jax.devices()[0].device_kind.lower()
    except Exception:
        return True
    single_tc = ("v5 lite", "v5e", "v5litepod", "v6 lite", "v6e")
    return not any(s in kind for s in single_tc)


def _pick_tile_n(n, tile_n, multi_tc):
    """Big tiles amortize the ~0.35us per-grid-step overhead.  On multi-TC
    chips keep >= ~4 grid steps so the 'parallel' grid axis can shard across
    TensorCores; on single-TC chips just take the biggest tile that covers N."""
    t = max(16, _round_up(tile_n, 16))              # bf16 sublane pack: 16 rows
    if multi_tc:
        t = min(t, max(256, _round_up(pl.cdiv(n, 4), 16)))
    t = min(t, _round_up(n, 16))
    return t


def _input_dims(config):
    if config.app_per_gauss_bg:
        d_in = (FEAT_IN + 6 * config.appearance_n_fourier_freqs
                + config.appearance_embedding_dim)
    else:
        d_in = config.appearance_embedding_dim
    return d_in, _round_up(d_in, 8)


def _linear_init(key, fan_in, fan_out):
    """PyTorch nn.Linear default init: U(-1/sqrt(fan_in), 1/sqrt(fan_in))."""
    kw, kb = jax.random.split(key)
    bound = 1.0 / jnp.sqrt(float(fan_in))
    # stored as (in, out) so the kernel does x @ W
    w = jax.random.uniform(kw, (fan_in, fan_out), jnp.float32, -bound, bound)
    b = jax.random.uniform(kb, (1, fan_out), jnp.float32, -bound, bound)
    return w, b


def _bg_mlp_kernel(compute_dtype, x_ref, w1_ref, b1_ref, w2_ref, b2_ref,
                   w3_ref, b3_ref, y_ref):
    """One N-tile of: Linear(K=d_pad) -> ReLU -> Linear -> ReLU -> merged Linear."""
    x = x_ref[...].astype(compute_dtype)                                  # (TN, d_pad)
    h = jnp.dot(x, w1_ref[...], preferred_element_type=jnp.float32)
    h = jnp.maximum(h + b1_ref[...], 0.0).astype(compute_dtype)           # (TN, 128)
    h = jnp.dot(h, w2_ref[...], preferred_element_type=jnp.float32)
    h = jnp.maximum(h + b2_ref[...], 0.0).astype(compute_dtype)           # (TN, 128)
    # W3/b3 already carry the *0.01 scale; cols 0-2 = offset, 3-5 = mul, 6-7 = 0.
    y = jnp.dot(h, w3_ref[...], preferred_element_type=jnp.float32) + b3_ref[...]
    y_ref[...] = y.astype(y_ref.dtype)                                    # (TN, 8)


def prepare_background_params(params, *, config=Config, use_bf16=True):
    """Fold the *0.01 output scale into W3/b3, merge + zero-pad them into one
    (128, 8) slab, zero-pad W1 rows to the packed input width, and cast matmul
    weights to the compute dtype.  Call once and reuse (weights are constant)."""
    w1, b1, w2, b2, w3, b3 = params
    d_in, d_pad = _input_dims(config)
    assert w1.shape == (d_in, HIDDEN), (w1.shape, d_in)
    compute_dtype = jnp.bfloat16 if use_bf16 else jnp.float32

    w1p = jnp.pad(jnp.asarray(w1, jnp.float32), ((0, d_pad - d_in), (0, 0)))
    w1p = w1p.astype(compute_dtype)                                   # (d_pad, 128)
    b1p = jnp.asarray(b1, jnp.float32).reshape(1, HIDDEN)
    w2c = jnp.asarray(w2, jnp.float32).astype(compute_dtype)          # (128, 128)
    b2p = jnp.asarray(b2, jnp.float32).reshape(1, HIDDEN)

    w3s = jnp.asarray(w3, jnp.float32) * 0.01                         # (128, 6)
    w3p = jnp.pad(w3s, ((0, 0), (0, OUT_PAD - OUT_DIM))).astype(compute_dtype)
    b3s = (jnp.asarray(b3, jnp.float32) * 0.01).reshape(1, OUT_DIM)
    b3p = jnp.pad(b3s, ((0, 0), (0, OUT_PAD - OUT_DIM)))              # (1, 8) f32
    return (w1p, b1p, w2c, b2p, w3p, b3p)


def background_model_apply(prepared, gembedding, aembedding, features_dc,
                           viewdir=None, *, config=Config, tile_n=2048,
                           use_bf16=True, out_dtype=jnp.float32):
    """Pallas implementation of BackgroundModel.forward with pre-prepared
    weights.  Returns (offset, mul), each of shape (N, 3)."""
    del viewdir  # unused, matching the PyTorch module
    w1p, b1p, w2c, b2p, w3p, b3p = prepared
    d_in, d_pad = _input_dims(config)
    in_dtype = jnp.bfloat16 if use_bf16 else jnp.float32
    compute_dtype = in_dtype

    if config.app_per_gauss_bg:
        parts = [features_dc, gembedding, aembedding]   # == torch.cat order
    else:
        parts = [aembedding]
    n = parts[0].shape[0]
    assert sum(p.shape[-1] for p in parts) == d_in

    # Pack the input streams once into one dense lane slab (N, d_pad) in the
    # compute dtype (zero-pad columns match W1's zero-padded rows).
    parts = [jnp.asarray(p, in_dtype) for p in parts]
    if d_pad > d_in:
        parts.append(jnp.zeros((n, d_pad - d_in), in_dtype))
    x = jnp.concatenate(parts, axis=-1)                               # (N, d_pad)

    multi_tc = _is_multi_tensorcore_chip()
    tn = _pick_tile_n(n, tile_n, multi_tc)
    grid = (pl.cdiv(n, tn),)          # non-divisible N: tail tile is masked
    full = lambda i: (0, 0)

    in_specs = [
        pl.BlockSpec((tn, d_pad), lambda i: (i, 0)),      # packed input
        pl.BlockSpec((d_pad, HIDDEN), full),              # W1 (rows zero-padded)
        pl.BlockSpec((1, HIDDEN), full),                  # b1
        pl.BlockSpec((HIDDEN, HIDDEN), full),             # W2
        pl.BlockSpec((1, HIDDEN), full),                  # b2
        pl.BlockSpec((HIDDEN, OUT_PAD), full),            # merged W3 (* 0.01)
        pl.BlockSpec((1, OUT_PAD), full),                 # merged b3 (* 0.01)
    ]
    out_specs = pl.BlockSpec((tn, OUT_PAD), lambda i: (i, 0))
    out_shape = jax.ShapeDtypeStruct((n, OUT_PAD), out_dtype)

    kernel = functools.partial(_bg_mlp_kernel, compute_dtype)
    y = pl.pallas_call(
        kernel,
        out_shape=out_shape,
        grid_spec=pltpu.PrefetchScalarGridSpec(
            num_scalar_prefetch=0,
            grid=grid,
            in_specs=in_specs,
            out_specs=out_specs,
        ),
        compiler_params=pltpu.CompilerParams(
            dimension_semantics=("parallel",),
            vmem_limit_bytes=32 * 1024 * 1024),
    )(x, w1p, b1p, w2c, b2p, w3p, b3p)

    # Cheap XLA slices on a tiny (N, 8) array; padding cols 6-7 are dropped.
    offset = y[:, :FEAT_IN]
    mul = y[:, FEAT_IN:OUT_DIM]
    return offset, mul


def background_model_forward(params, gembedding, aembedding, features_dc,
                             viewdir=None, *, config=Config, tile_n=2048,
                             use_bf16=True, out_dtype=jnp.float32):
    """Convenience wrapper: prepare weights then apply (prefer preparing once)."""
    prepared = prepare_background_params(params, config=config, use_bf16=use_bf16)
    return background_model_apply(prepared, gembedding, aembedding, features_dc,
                                  viewdir, config=config, tile_n=tile_n,
                                  use_bf16=use_bf16, out_dtype=out_dtype)


def _reference_forward(params, gembedding, aembedding, features_dc,
                       config=Config):
    """Pure-JAX reference matching the PyTorch semantics (f32 throughout)."""
    if config.app_per_gauss_bg:
        inp = jnp.concatenate((features_dc, gembedding, aembedding), axis=-1)
    else:
        inp = aembedding
    w1, b1, w2, b2, w3, b3 = params
    h = jnp.maximum(inp @ w1 + b1, 0.0)
    h = jnp.maximum(h @ w2 + b2, 0.0)
    y = (h @ w3 + b3) * 0.01
    return y[:, :FEAT_IN], y[:, FEAT_IN:]


if __name__ == "__main__":
    cfg = Config
    n_gauss = 300                                            # not a tile multiple
    gdim = 6 * cfg.appearance_n_fourier_freqs                # 24
    adim = cfg.appearance_embedding_dim                      # 32
    input_dim = adim
    if cfg.app_per_gauss:
        input_dim += gdim + FEAT_IN                          # 59

    key = jax.random.PRNGKey(0)
    k_in, k_w1, k_w2, k_w3 = jax.random.split(key, 4)
    k_g, k_a, k_f = jax.random.split(k_in, 3)

    gembedding = jax.random.normal(k_g, (n_gauss, gdim), jnp.float32)
    aembedding = jax.random.normal(k_a, (n_gauss, adim), jnp.float32)
    features_dc = jax.random.normal(k_f, (n_gauss, FEAT_IN), jnp.float32)

    w1, b1 = _linear_init(k_w1, input_dim, HIDDEN)
    w2, b2 = _linear_init(k_w2, HIDDEN, HIDDEN)
    w3, b3 = _linear_init(k_w3, HIDDEN, OUT_DIM)
    params = (w1, b1, w2, b2, w3, b3)

    ref_offset, ref_mul = _reference_forward(
        params, gembedding, aembedding, features_dc)

    # Exact f32 path (tight tolerance).
    off_f32, mul_f32 = background_model_forward(
        params, gembedding, aembedding, features_dc, use_bf16=False)
    jax.block_until_ready((off_f32, mul_f32))
    assert off_f32.shape == (n_gauss, FEAT_IN) and mul_f32.shape == (n_gauss, FEAT_IN)
    assert jnp.allclose(off_f32, ref_offset, atol=5e-5, rtol=1e-3)
    assert jnp.allclose(mul_f32, ref_mul, atol=5e-5, rtol=1e-3)

    # Fast bf16 path (default): weights prepared once and reused.
    prepared = prepare_background_params(params, use_bf16=True)
    offset, mul = background_model_apply(
        prepared, gembedding, aembedding, features_dc, use_bf16=True)
    jax.block_until_ready((offset, mul))
    assert offset.shape == (n_gauss, FEAT_IN) and mul.shape == (n_gauss, FEAT_IN)
    # Intentional bf16 precision trade -> looser tolerance.
    assert jnp.allclose(offset, ref_offset, atol=3e-3, rtol=5e-2)
    assert jnp.allclose(mul, ref_mul, atol=3e-3, rtol=5e-2)

    print("KERNEL_OK")
</pallas_src>

<mosaic_0001>
module attributes {stable_mosaic.version = 11 : i64} {
  func.func @_bg_mlp_kernel(%arg0: i32, %arg1: memref<256x64xf32, #tpu.memory_space<vmem>>, %arg2: memref<64x128xf32, #tpu.memory_space<vmem>>, %arg3: memref<1x128xf32, #tpu.memory_space<vmem>>, %arg4: memref<128x128xf32, #tpu.memory_space<vmem>>, %arg5: memref<1x128xf32, #tpu.memory_space<vmem>>, %arg6: memref<128x8xf32, #tpu.memory_space<vmem>>, %arg7: memref<1x8xf32, #tpu.memory_space<vmem>>, %arg8: memref<256x8xf32, #tpu.memory_space<vmem>>) attributes {dimension_semantics = [#tpu.dimension_semantics<parallel>], iteration_bounds = array<i64: 2>, scalar_prefetch = 0 : i64, scratch_operands = 0 : i64, tpu.core_type = #tpu.core_type<tc>, window_params = [{transform_indices = @transform_0, window_bounds = array<i64: 256, 64>}, {pipeline_mode = #tpu.pipeline_mode<synchronous>, transform_indices = @transform_1, window_bounds = array<i64: 64, 128>}, {pipeline_mode = #tpu.pipeline_mode<synchronous>, transform_indices = @transform_2, window_bounds = array<i64: 1, 128>}, {pipeline_mode = #tpu.pipeline_mode<synchronous>, transform_indices = @transform_3, window_bounds = array<i64: 128, 128>}, {pipeline_mode = #tpu.pipeline_mode<synchronous>, transform_indices = @transform_4, window_bounds = array<i64: 1, 128>}, {pipeline_mode = #tpu.pipeline_mode<synchronous>, transform_indices = @transform_5, window_bounds = array<i64: 128, 8>}, {pipeline_mode = #tpu.pipeline_mode<synchronous>, transform_indices = @transform_6, window_bounds = array<i64: 1, 8>}, {transform_indices = @transform_7, window_bounds = array<i64: 256, 8>}]} {
    %c0 = arith.constant 0 : index
    %c0_0 = arith.constant 0 : index
    %0 = vector.load %arg1[%c0, %c0_0] : memref<256x64xf32, #tpu.memory_space<vmem>>, vector<256x64xf32>
    %c0_1 = arith.constant 0 : index
    %c0_2 = arith.constant 0 : index
    %1 = vector.load %arg2[%c0_1, %c0_2] : memref<64x128xf32, #tpu.memory_space<vmem>>, vector<64x128xf32>
    %cst = arith.constant dense<0.000000e+00> : vector<256x128xf32>
    %2 = tpu.matmul %0, %1, %cst {dimension_numbers = #tpu.dot_dimension_numbers<[1], [0], [0], [1], [0, 0, 1, 1], [], []>} : vector<256x64xf32>, vector<64x128xf32>, vector<256x128xf32> -> vector<256x128xf32>
    %c0_3 = arith.constant 0 : index
    %c0_4 = arith.constant 0 : index
    %3 = vector.load %arg3[%c0_3, %c0_4] : memref<1x128xf32, #tpu.memory_space<vmem>>, vector<1x128xf32>
    %4 = vector.broadcast %3 : vector<1x128xf32> to vector<256x128xf32>
    %5 = arith.addf %2, %4 : vector<256x128xf32>
    %cst_5 = arith.constant 0.000000e+00 : f32
    %6 = vector.broadcast %cst_5 : f32 to vector<256x128xf32>
    %7 = arith.maximumf %5, %6 : vector<256x128xf32>
    %c0_6 = arith.constant 0 : index
    %c0_7 = arith.constant 0 : index
    %8 = vector.load %arg4[%c0_6, %c0_7] : memref<128x128xf32, #tpu.memory_space<vmem>>, vector<128x128xf32>
    %cst_8 = arith.constant dense<0.000000e+00> : vector<256x128xf32>
    %9 = tpu.matmul %7, %8, %cst_8 {dimension_numbers = #tpu.dot_dimension_numbers<[1], [0], [0], [1], [0, 0, 1, 1], [], []>} : vector<256x128xf32>, vector<128x128xf32>, vector<256x128xf32> -> vector<256x128xf32>
    %c0_9 = arith.constant 0 : index
    %c0_10 = arith.constant 0 : index
    %10 = vector.load %arg5[%c0_9, %c0_10] : memref<1x128xf32, #tpu.memory_space<vmem>>, vector<1x128xf32>
    %11 = vector.broadcast %10 : vector<1x128xf32> to vector<256x128xf32>
    %12 = arith.addf %9, %11 : vector<256x128xf32>
    %cst_11 = arith.constant 0.000000e+00 : f32
    %13 = vector.broadcast %cst_11 : f32 to vector<256x128xf32>
    %14 = arith.maximumf %12, %13 : vector<256x128xf32>
    %c0_12 = arith.constant 0 : index
    %c0_13 = arith.constant 0 : index
    %15 = vector.load %arg6[%c0_12, %c0_13] : memref<128x8xf32, #tpu.memory_space<vmem>>, vector<128x8xf32>
    %cst_14 = arith.constant dense<0.000000e+00> : vector<256x8xf32>
    %16 = tpu.matmul %14, %15, %cst_14 {dimension_numbers = #tpu.dot_dimension_numbers<[1], [0], [0], [1], [0, 0, 1, 1], [], []>} : vector<256x128xf32>, vector<128x8xf32>, vector<256x8xf32> -> vector<256x8xf32>
    %c0_15 = arith.constant 0 : index
    %c0_16 = arith.constant 0 : index
    %17 = vector.load %arg7[%c0_15, %c0_16] : memref<1x8xf32, #tpu.memory_space<vmem>>, vector<1x8xf32>
    %18 = vector.broadcast %17 : vector<1x8xf32> to vector<256x8xf32>
    %19 = arith.addf %16, %18 : vector<256x8xf32>
    %c0_17 = arith.constant 0 : index
    %c0_18 = arith.constant 0 : index
    %20 = vector.load %arg8[%c0_17, %c0_18] : memref<256x8xf32, #tpu.memory_space<vmem>>, vector<256x8xf32>
    tpu.vector_store %arg8[%c0_17, %c0_18], %19 {strides = array<i32>} : memref<256x8xf32, #tpu.memory_space<vmem>>, vector<256x8xf32>,
    return
  }
  func.func @transform_0(%arg0: i32) -> (i32, i32) {
    %c0_i32 = arith.constant 0 : i32
    %c0_i32_0 = arith.constant 0 : i32
    return %arg0, %c0_i32 : i32, i32
  }
  func.func @transform_1(%arg0: i32) -> (i32, i32) {
    %c0_i32 = arith.constant 0 : i32
    %c0_i32_0 = arith.constant 0 : i32
    %c0_i32_1 = arith.constant 0 : i32
    return %c0_i32, %c0_i32_0 : i32, i32
  }
  func.func @transform_2(%arg0: i32) -> (i32, i32) {
    %c0_i32 = arith.constant 0 : i32
    %c0_i32_0 = arith.constant 0 : i32
    %c0_i32_1 = arith.constant 0 : i32
    return %c0_i32, %c0_i32_0 : i32, i32
  }
  func.func @transform_3(%arg0: i32) -> (i32, i32) {
    %c0_i32 = arith.constant 0 : i32
    %c0_i32_0 = arith.constant 0 : i32
    %c0_i32_1 = arith.constant 0 : i32
    return %c0_i32, %c0_i32_0 : i32, i32
  }
  func.func @transform_4(%arg0: i32) -> (i32, i32) {
    %c0_i32 = arith.constant 0 : i32
    %c0_i32_0 = arith.constant 0 : i32
    %c0_i32_1 = arith.constant 0 : i32
    return %c0_i32, %c0_i32_0 : i32, i32
  }
  func.func @transform_5(%arg0: i32) -> (i32, i32) {
    %c0_i32 = arith.constant 0 : i32
    %c0_i32_0 = arith.constant 0 : i32
    %c0_i32_1 = arith.constant 0 : i32
    return %c0_i32, %c0_i32_0 : i32, i32
  }
  func.func @transform_6(%arg0: i32) -> (i32, i32) {
    %c0_i32 = arith.constant 0 : i32
    %c0_i32_0 = arith.constant 0 : i32
    %c0_i32_1 = arith.constant 0 : i32
    return %c0_i32, %c0_i32_0 : i32, i32
  }
  func.func @transform_7(%arg0: i32) -> (i32, i32) {
    %c0_i32 = arith.constant 0 : i32
    %c0_i32_0 = arith.constant 0 : i32
    return %arg0, %c0_i32 : i32, i32
  }
}

</mosaic_0001>

<bundles_post_ra>
// kernel: tpu_custom_call.1
= control target key start
LH: loop header
LB: loop body
LE: loop exit
PB: predicated region body
PF: predicated region fallthrough
CT: control target
= control target key end

     0   :  { %s1575_s24 = smov 0   ;;  %s1577_s25 = smov 0   ;;  %s2118_s0 = inlined_call_operand.vmem [shape: f32[300,64], index: 0, kind: input, shape index: {}]   ;;  %s2119_s1 = inlined_call_operand.vmem [shape: f32[64,128], index: 1, kind: input, shape index: {}]   ;;  %s2120_s2 = inlined_call_operand.vmem [shape: f32[1,128], index: 2, kind: input, shape index: {}]   ;;  %s2121_s3 = inlined_call_operand.vmem [shape: f32[128,128], index: 3, kind: input, shape index: {}]   ;;  %s2122_s4 = inlined_call_operand.vmem [shape: f32[1,128], index: 4, kind: input, shape index: {}]   ;;  %s2123_s5 = inlined_call_operand.vmem [shape: f32[128,8], index: 5, kind: input, shape index: {}]   ;;  %s2124_s6 = inlined_call_operand.vmem [shape: f32[1,8], index: 6, kind: input, shape index: {}]   ;;  %s2125_s7 = inlined_call_operand.vmem [shape: f32[300,8], index: 7, kind: output, shape index: {}]  }
   0x1   :  { %s1579_s26 = smov 0  }
   0x2 LB: > { %s1588_s27 = sadd.s32 4294967295, %s1501_s26   ;;  %s1590_s28 = sadd.s32 1, %s1501_s26   ;;  %s1501_s26 = sphi %s1579_s26, %s2134_s26   ;;  %s1497_s25 = sphi %s1577_s25, %s2133_s25   ;;  %s1493_s24 = sphi %s1575_s24, %s2132_s24  }
   0x3   : > { %s173_s29 = ssub.s32 %s1501_s26, %s1590_s28  ;;  %s176_s30 = sadd.s32 1, %s1497_s25 }
   0x4   : > { %p174_p0 = scmp.eq.s32.totalorder %s173_s29, 0  ;;  %p186_p1 = scmp.ne.s32.totalorder %s1497_s25, %s1493_s24 }
   0x5   : > { %p187_p2 = scmp.eq.s32.totalorder %s1588_s27, 1  ;;  %p1260_p3 = scmp.ge.s32.totalorder %s1501_s26, 1 }
   0x6   : > { %s1598_s8 = scalar_select %p174_p0, %s1497_s25, %s176_s30  }
   0x7   : > { %p1600_p4 = por %p187_p2, %p186_p1  ;;  %p246_p5 = scmp.lt.s32.totalorder %s1501_s26, 3 }
   0x9   : > { %p247_p6 = pnand %p1260_p3, %p246_p5 }
   0xa   : > { %s1611_s14 = sshll.u32 (!%p247_p6), %s1588_s27, 5 }
   0xb   : > { %250 = sbr.rel (%p247_p6) target bundleno = 745 (0x2e9), region = 48  ;;  %p286_p7 = scmp.lt.s32.totalorder (!%p247_p6), %s1611_s14, 37 }
  0x10   : > { %v339_v0 = vld [vmem:[%s2119_s1 + $0x38] sm:$0xff]  ;;  %v338_v1 = vld [vmem:[%s2119_s1 + $0x30] sm:$0xff]  ;;  %v337_v2 = vld [vmem:[%s2119_s1 + $0x28] sm:$0xff]  ;;  %s287_s17 = scalar_select %p286_p7, %s1611_s14, 37  ;;  %vm344_vm0 = vcmask 523264   ;;  %vm884_vm1 = vcmask 64512  }
  0x11   : > { %449 = vmatpush.msra.mxu0 %v339_v0  ;;  %1316 = vmatpush.msra.mxu3 %v339_v0  ;;  %v336_v3 = vld [vmem:[%s2119_s1 + $0x20] sm:$0xff]  ;;  %v335_v4 = vld [vmem:[%s2119_s1 + $0x18] sm:$0xff]  ;;  %v334_v5 = vld [vmem:[%s2119_s1 + $0x10] sm:$0xff]  ;;  %s1313_s10 = sshll.u32 (%p1600_p4), %s1588_s27, 8 }
  0x12   : > { %s1263_s22 = sshll.u32 %s287_s17, 3  ;;  %v333_v6 = vld [vmem:[%s2119_s1 + $0x8] sm:$0xff]  ;;  %v332_v7 = vld [vmem:[%s2119_s1] sm:$0xff]  ;;  %v601_v17 = vld [vmem:[%s2121_s3 + $0x78] sm:$0xff]  ;;  %s1983_s15 = scalar_lea.vmem (%p1600_p4), %s2125_s7, %s1313_s10  }
  0x13   : > { %450 = vmatpush.msra.mxu0 %v338_v1  ;;  %1317 = vmatpush.msra.mxu3 %v338_v1  ;;  %s1633_s12 = scalar_lea.vmem %s2118_s0, %s1263_s22  ;;  %v600_v18 = vld [vmem:[%s2121_s3 + $0x70] sm:$0xff]  ;;  %v599_v19 = vld [vmem:[%s2121_s3 + $0x68] sm:$0xff]  ;;  %v598_v21 = vld [vmem:[%s2121_s3 + $0x60] sm:$0xff] }
  0x14   : > { %v300_v8 = vld [vmem:[%s1633_s12] sm:$0xff]  ;;  %v301_v9 = vld [vmem:[%s1633_s12 + $0x8] sm:$0xff]  ;;  %v302_v10 = vld [vmem:[%s1633_s12 + $0x10] sm:$0xff]  ;;  %606 = vmatpush.msra.mxu1 %v601_v17 }
  0x15   : > { %451 = vmatpush.msra.mxu0 %v337_v2  ;;  %1318 = vmatpush.msra.mxu3 %v337_v2  ;;  %v303_v11 = vld [vmem:[%s1633_s12 + $0x18] sm:$0xff]  ;;  %v304_v12 = vld [vmem:[%s1633_s12 + $0x20] sm:$0xff]  ;;  %v305_v13 = vld [vmem:[%s1633_s12 + $0x28] sm:$0xff] }
  0x16   : > { %v306_v14 = vld [vmem:[%s1633_s12 + $0x30] sm:$0xff]  ;;  %v307_v15 = vld [vmem:[%s1633_s12 + $0x38] sm:$0xff]  ;;  %v308_v16 = vld [vmem:[%s1633_s12 + $0x40] sm:$0xff]  ;;  %607 = vmatpush.msra.mxu1 %v600_v18 }
  0x17   : > { %452 = vmatpush.msra.mxu0 %v336_v3  ;;  %1319 = vmatpush.msra.mxu3 %v336_v3  ;;  %v309_v20 = vld [vmem:[%s1633_s12 + $0x48] sm:$0xff]  ;;  %v597_v22 = vld [vmem:[%s2121_s3 + $0x58] sm:$0xff]  ;;  %v596_v23 = vld [vmem:[%s2121_s3 + $0x50] sm:$0xff] }
  0x18   : > { %608 = vmatpush.msra.mxu1 %v599_v19  ;;  %v595_v24 = vld [vmem:[%s2121_s3 + $0x48] sm:$0xff]  ;;  %v310_v25 = vld [vmem:[%s1633_s12 + $0x50] sm:$0xff]  ;;  %v594_v26 = vld [vmem:[%s2121_s3 + $0x40] sm:$0xff] }
  0x19   : > { %453 = vmatpush.msra.mxu0 %v335_v4  ;;  %1320 = vmatpush.msra.mxu3 %v335_v4  ;;  %v593_v27 = vld [vmem:[%s2121_s3 + $0x38] sm:$0xff]  ;;  %v592_v28 = vld [vmem:[%s2121_s3 + $0x30] sm:$0xff]  ;;  %v591_v29 = vld [vmem:[%s2121_s3 + $0x28] sm:$0xff] }
  0x1a   : > { %609 = vmatpush.msra.mxu1 %v598_v21  ;;  %v311_v30 = vld [vmem:[%s1633_s12 + $0x58] sm:$0xff]  ;;  %v590_v31 = vld [vmem:[%s2121_s3 + $0x20] sm:$0xff]  ;;  %v588_v33 = vld [vmem:[%s2121_s3 + $0x10] sm:$0xff] }
  0x1b   : > { %454 = vmatpush.msra.mxu0 %v334_v5  ;;  %1321 = vmatpush.msra.mxu3 %v334_v5  ;;  %v589_v32 = vld [vmem:[%s2121_s3 + $0x18] sm:$0xff]  ;;  %v312_v34 = vld [vmem:[%s1633_s12 + $0x60] sm:$0xff]  ;;  %v587_v35 = vld [vmem:[%s2121_s3 + $0x8] sm:$0xff] }
  0x1c   : > { %610 = vmatpush.msra.mxu1 %v597_v22  ;;  %v586_v36 = vld [vmem:[%s2121_s3] sm:$0xff]  ;;  %v313_v37 = vld [vmem:[%s1633_s12 + $0x68] sm:$0xff]  ;;  %v314_v38 = vld [vmem:[%s1633_s12 + $0x70] sm:$0xff] }
  0x1d   : > { %455 = vmatpush.msra.mxu0 %v333_v6  ;;  %1322 = vmatpush.msra.mxu3 %v333_v6  ;;  %v315_v39 = vld [vmem:[%s1633_s12 + $0x78] sm:$0xff]  ;;  %v1721_v40 = vld [vmem:[%s2120_s2] ss:$0 sm:$0xff]  ;;  %v317_v46 = vld [vmem:[%s1633_s12 + $0x88] sm:$0xff] }
  0x1e   : > { %611 = vmatpush.msra.mxu1 %v596_v23  ;;  %v316_v42 = vld [vmem:[%s1633_s12 + $0x80] sm:$0xff]  ;;  %v318_v50 = vld [vmem:[%s1633_s12 + $0x90] sm:$0xff]  ;;  %v319_v54 = vld [vmem:[%s1633_s12 + $0x98] sm:$0xff] }
  0x1f   : > { %456 = vmatpush.msra.mxu0 %v332_v7  ;;  %1323 = vmatpush.msra.mxu3 %v332_v7  ;;  %v320_v58 = vld [vmem:[%s1633_s12 + $0xa0] sm:$0xff]  ;;  %v325_v61 = vld [vmem:[%s1633_s12 + $0xc8] sm:$0xff]  ;;  %v326_v2 = vld [vmem:[%s1633_s12 + $0xd0] sm:$0xff] }
  0x20   : > { %1264 = vmatmul.msk.f32.vlgmr.msra.gmra.mxu0 %vm344_vm0, %v300_v8  ;;  %612 = vmatpush.msra.mxu1 %v595_v24  ;;  %v321_v63 = vld [vmem:[%s1633_s12 + $0xa8] sm:$0xff]  ;;  %v322_v4 = vld [vmem:[%s1633_s12 + $0xb0] sm:$0xff]  ;;  %v327_v7 = vld [vmem:[%s1633_s12 + $0xd8] sm:$0xff] }
  0x21   : > { %1324 = vmatpush.msrb.mxu3 %v601_v17  ;;  %v329_v17 = vld [vmem:[%s1633_s12 + $0xe8] sm:$0xff] }
  0x22   : > { %613 = vmatpush.msra.mxu1 %v594_v26  ;;  %1289 = vmatmul.msk.f32.vlgmr.msra.gmra.mxu3 %vm344_vm0, %v325_v61 }
  0x23   : > { %1325 = vmatpush.msrb.mxu3 %v600_v18  ;;  %v766_v18 = vld [vmem:[%s2123_s5 + $0x78] sm:$0xff] }
  0x24   : > { %614 = vmatpush.msra.mxu1 %v593_v27  ;;  %771 = vmatpush.msra.mxu2 %v766_v18 }
  0x25   : > { %1326 = vmatpush.msrb.mxu3 %v599_v19 }
  0x26   : > { %615 = vmatpush.msra.mxu1 %v592_v28 }
  0x27   : > { %1327 = vmatpush.msrb.mxu3 %v598_v21  ;;  %v765_v21 = vld [vmem:[%s2123_s5 + $0x70] sm:$0xff] }
  0x28   : > { %1265 = vmatmul.msk.f32.gmra.mxu0 %vm344_vm0, %v301_v9  ;;  %616 = vmatpush.msra.mxu1 %v591_v29  ;;  %v323_v9 = vld [vmem:[%s1633_s12 + $0xb8] sm:$0xff] }
  0x29   : > { %1328 = vmatpush.msrb.mxu3 %v597_v22  ;;  %772 = vmatpush.msra.mxu2 %v765_v21 }
  0x2a   : > { %617 = vmatpush.msra.mxu1 %v590_v31  ;;  %1290 = vmatmul.msk.f32.gmra.mxu3 %vm344_vm0, %v326_v2 }
  0x2b   : > { %1329 = vmatpush.msrb.mxu3 %v596_v23  ;;  %v764_v23 = vld [vmem:[%s2123_s5 + $0x68] sm:$0xff] }
  0x2c   : > { %618 = vmatpush.msra.mxu1 %v589_v32  ;;  %773 = vmatpush.msra.mxu2 %v764_v23 }
  0x2d   : > { %1330 = vmatpush.msrb.mxu3 %v595_v24  ;;  %v330_v24 = vld [vmem:[%s1633_s12 + $0xf0] sm:$0xff] }
  0x2e   : > { %619 = vmatpush.msra.mxu1 %v588_v33 }
  0x2f   : > { %1331 = vmatpush.msrb.mxu3 %v594_v26  ;;  %v762_v26 = vld [vmem:[%s2123_s5 + $0x58] sm:$0xff] }
  0x30   : > { %1266 = vmatmul.msk.f32.gmra.mxu0 %vm344_vm0, %v302_v10  ;;  %620 = vmatpush.msra.mxu1 %v587_v35 }
  0x31   : > { %1332 = vmatpush.msrb.mxu3 %v593_v27 }
  0x32   : > { %621 = vmatpush.msra.mxu1 %v586_v36  ;;  %1291 = vmatmul.msk.f32.gmra.mxu3 %vm344_vm0, %v327_v7 }
  0x33   : > { %1333 = vmatpush.msrb.mxu3 %v592_v28 }
  0x35   : > { %1334 = vmatpush.msrb.mxu3 %v591_v29  ;;  %v761_v29 = vld [vmem:[%s2123_s5 + $0x50] sm:$0xff] }
  0x37   : > { %1335 = vmatpush.msrb.mxu3 %v590_v31  ;;  %v760_v31 = vld [vmem:[%s2123_s5 + $0x48] sm:$0xff] }
  0x38   : > { %1267 = vmatmul.msk.f32.gmra.mxu0 %vm344_vm0, %v303_v11 }
  0x39   : > { %1336 = vmatpush.msrb.mxu3 %v589_v32  ;;  %v331_v32 = vld [vmem:[%s1633_s12 + $0xf8] sm:$0xff] }
  0x3b   : > { %1337 = vmatpush.msrb.mxu3 %v588_v33  ;;  %v759_v33 = vld [vmem:[%s2123_s5 + $0x40] sm:$0xff] }
  0x3d   : > { %1338 = vmatpush.msrb.mxu3 %v587_v35 }
  0x3f   : > { %1339 = vmatpush.msrb.mxu3 %v586_v36 }
  0x40   : > { %1268 = vmatmul.msk.f32.gmra.mxu0 %vm344_vm0, %v304_v12  ;;  %v328_v12 = vld [vmem:[%s1633_s12 + $0xe0] sm:$0xff] }
  0x41   : > { %1292 = vmatmul.msk.f32.gmra.mxu3 %vm344_vm0, %v328_v12 }
  0x42   : > { %1340 = vmatpush.msra.mxu3 %v766_v18 }
  0x44   : > { %1341 = vmatpush.msra.mxu3 %v765_v21 }
  0x46   : > { %1342 = vmatpush.msra.mxu3 %v764_v23 }
  0x48   : > { %1269 = vmatmul.msk.f32.gmra.mxu0 %vm344_vm0, %v305_v13 }
  0x49   : > { %1293 = vmatmul.msk.f32.gmra.mxu3 %vm344_vm0, %v329_v17 }
  0x50   : > { %1270 = vmatmul.msk.f32.gmra.mxu0 %vm344_vm0, %v306_v14  ;;  %v324_v14 = vld [vmem:[%s1633_s12 + $0xc0] sm:$0xff]  ;;  %s278_s12 = sand.u32 1, %s1493_s24   ;;  %s925_s24 = ssub.s32 (%p1600_p4), 38, %s1611_s14 }
  0x51   : > { %1294 = vmatmul.msk.f32.gmra.mxu3 %vm344_vm0, %v330_v24  ;;  %s1261_s23 = sshll.u32 %s278_s12, 8  ;;  %p926_p8 = scmp.lt.s32.totalorder (%p1600_p4), %s925_s24, 32 }
  0x52   : > { %s1865_s30 = scalar_lea.vmem [#allocation2], %s1261_s23  }
  0x58   : > { %1271 = vmatmul.msk.f32.gmra.mxu0 %vm344_vm0, %v307_v15 }
  0x59   : > { %1295 = vmatmul.msk.f32.gmra.mxu3 %vm344_vm0, %v331_v32 }
  0x60   : > { %1272 = vmatmul.msk.f32.gmra.mxu0 %vm344_vm0, %v308_v16 }
  0x68   : > { %1273 = vmatmul.msk.f32.gmra.mxu0 %vm344_vm0, %v309_v20 }
  0x70   : > { %1274 = vmatmul.msk.f32.gmra.mxu0 %vm344_vm0, %v310_v25  ;;  %v763_v25 = vld [vmem:[%s2123_s5 + $0x60] sm:$0xff] }
  0x71   : > { %774 = vmatpush.msra.mxu2 %v763_v25  ;;  %1343 = vmatpush.msra.mxu3 %v763_v25 }
  0x73   : > { %775 = vmatpush.msra.mxu2 %v762_v26  ;;  %1344 = vmatpush.msra.mxu3 %v762_v26 }
  0x75   : > { %776 = vmatpush.msra.mxu2 %v761_v29  ;;  %1345 = vmatpush.msra.mxu3 %v761_v29 }
  0x77   : > { %777 = vmatpush.msra.mxu2 %v760_v31  ;;  %1346 = vmatpush.msra.mxu3 %v760_v31 }
  0x78   : > { %1275 = vmatmul.msk.f32.gmra.mxu0 %vm344_vm0, %v311_v30 }
  0x79   : > { %778 = vmatpush.msra.mxu2 %v759_v33  ;;  %1347 = vmatpush.msra.mxu3 %v759_v33 }
  0x80   : > { %1276 = vmatmul.msk.f32.gmra.mxu0 %vm344_vm0, %v312_v34  ;;  %v758_v34 = vld [vmem:[%s2123_s5 + $0x38] sm:$0xff] }
  0x81   : > { %779 = vmatpush.msra.mxu2 %v758_v34  ;;  %1348 = vmatpush.msra.mxu3 %v758_v34 }
  0x88   : > { %1277 = vmatmul.msk.f32.gmra.mxu0 %vm344_vm0, %v313_v37  ;;  %v757_v37 = vld [vmem:[%s2123_s5 + $0x30] sm:$0xff] }
  0x89   : > { %780 = vmatpush.msra.mxu2 %v757_v37  ;;  %1349 = vmatpush.msra.mxu3 %v757_v37 }
  0x90   : > { %1278 = vmatmul.msk.f32.gmra.mxu0 %vm344_vm0, %v314_v38 }
  0x98   : > { %1279 = vmatmul.msk.f32.gmra.mxu0 %vm344_vm0, %v315_v39  ;;  %v756_v39 = vld [vmem:[%s2123_s5 + $0x28] sm:$0xff] }
  0x99   : > { %781 = vmatpush.msra.mxu2 %v756_v39  ;;  %1350 = vmatpush.msra.mxu3 %v756_v39 }
  0x9d   : > { %v458_v41 = vpop.f32.mrf.mxu0 }
  0x9e   : > { %v459_v43 = vadd.f32 %v1721_v40, %v458_v41  ;;  %v755_v41 = vld [vmem:[%s2123_s5 + $0x20] sm:$0xff] }
  0x9f   : > { %782 = vmatpush.msra.mxu2 %v755_v41  ;;  %1351 = vmatpush.msra.mxu3 %v755_v41 }
  0xa0   : > { %1280 = vmatmul.msk.f32.gmra.mxu0 %vm344_vm0, %v316_v42  ;;  %v554_v44 = vmax.f32 %v459_v43, 0.0  ;;  %v754_v42 = vld [vmem:[%s2123_s5 + $0x18] sm:$0xff] }
  0xa1   : > { %783 = vmatpush.msra.mxu2 %v754_v42  ;;  %1352 = vmatpush.msra.mxu3 %v754_v42 }
  0xa2   : > { %622 = vmatmul.f32.vlgmr.msra.gmra.mxu1 %v554_v44 }
  0xa5   : > { %v461_v45 = vpop.f32.mrf.mxu0  ;;  %v533_v37 = vpop.f32.mrf.mxu3 }
  0xa6   : > { %v462_v47 = vadd.f32 %v1721_v40, %v461_v45  ;;  %v753_v45 = vld [vmem:[%s2123_s5 + $0x10] sm:$0xff] }
  0xa7   : > { %784 = vmatpush.msra.mxu2 %v753_v45  ;;  %1353 = vmatpush.msra.mxu3 %v753_v45 }
  0xa8   : > { %v555_v48 = vmax.f32 %v462_v47, 0.0  ;;  %1281 = vmatmul.msk.f32.gmra.mxu0 %vm344_vm0, %v317_v46  ;;  %v752_v47 = vld [vmem:[%s2123_s5 + $0x8] sm:$0xff] }
  0xa9   : > { %785 = vmatpush.msra.mxu2 %v752_v47  ;;  %1354 = vmatpush.msra.mxu3 %v752_v47 }
  0xaa   : > { %625 = vmatmul.f32.gmra.mxu1 %v555_v48  ;;  %v751_v48 = vld [vmem:[%s2123_s5] sm:$0xff] }
  0xab   : > { %786 = vmatpush.msra.mxu2 %v751_v48  ;;  %1355 = vmatpush.msra.mxu3 %v751_v48 }
  0xad   : > { %v464_v49 = vpop.f32.mrf.mxu0 }
  0xae   : > { %v465_v51 = vadd.f32 %v1721_v40, %v464_v49 }
  0xb0   : > { %v556_v52 = vmax.f32 %v465_v51, 0.0  ;;  %1282 = vmatmul.msk.f32.gmra.mxu0 %vm344_vm0, %v318_v50 }
  0xb2   : > { %628 = vmatmul.f32.gmra.mxu1 %v556_v52 }
  0xb5   : > { %v467_v53 = vpop.f32.mrf.mxu0 }
  0xb6   : > { %v468_v55 = vadd.f32 %v1721_v40, %v467_v53 }
  0xb8   : > { %v557_v56 = vmax.f32 %v468_v55, 0.0  ;;  %1283 = vmatmul.msk.f32.gmra.mxu0 %vm344_vm0, %v319_v54 }
  0xba   : > { %631 = vmatmul.f32.gmra.mxu1 %v557_v56 }
  0xbd   : > { %v470_v57 = vpop.f32.mrf.mxu0 }
  0xbe   : > { %v471_v59 = vadd.f32 %v1721_v40, %v470_v57 }
  0xc0   : > { %v558_v60 = vmax.f32 %v471_v59, 0.0  ;;  %1284 = vmatmul.msk.f32.gmra.mxu0 %vm344_vm0, %v320_v58  ;;  %v1822_v58 = vld [vmem:[%s2122_s4] ss:$0 sm:$0xff] }
  0xc2   : > { %634 = vmatmul.f32.gmra.mxu1 %v558_v60 }
  0xc5   : > { %v473_v62 = vpop.f32.mrf.mxu0 }
  0xc6   : > { %v474_v0 = vadd.f32 %v1721_v40, %v473_v62 }
  0xc8   : > { %v559_v1 = vmax.f32 %v474_v0, 0.0  ;;  %1285 = vmatmul.msk.f32.gmra.mxu0 %vm344_vm0, %v321_v63 }
  0xca   : > { %637 = vmatmul.f32.gmra.mxu1 %v559_v1 }
  0xcd   : > { %v476_v3 = vpop.f32.mrf.mxu0 }
  0xce   : > { %v477_v5 = vadd.f32 %v1721_v40, %v476_v3 }
  0xd0   : > { %v560_v6 = vmax.f32 %v477_v5, 0.0  ;;  %1286 = vmatmul.msk.f32.gmra.mxu0 %vm344_vm0, %v322_v4 }
  0xd2   : > { %640 = vmatmul.f32.gmra.mxu1 %v560_v6 }
  0xd5   : > { %v479_v8 = vpop.f32.mrf.mxu0 }
  0xd6   : > { %v480_v10 = vadd.f32 %v1721_v40, %v479_v8 }
  0xd8   : > { %v561_v11 = vmax.f32 %v480_v10, 0.0  ;;  %1287 = vmatmul.msk.f32.gmra.mxu0 %vm344_vm0, %v323_v9 }
  0xda   : > { %643 = vmatmul.f32.gmra.mxu1 %v561_v11 }
  0xdd   : > { %v482_v13 = vpop.f32.mrf.mxu0 }
  0xde   : > { %v483_v15 = vadd.f32 %v1721_v40, %v482_v13 }
  0xe0   : > { %v562_v16 = vmax.f32 %v483_v15, 0.0  ;;  %1288 = vmatmul.msk.f32.gmra.mxu0 %vm344_vm0, %v324_v14 }
  0xe2   : > { %646 = vmatmul.f32.gmra.mxu1 %v562_v16 }
  0xe5   : > { %v485_v19 = vpop.f32.mrf.mxu0 }
  0xe6   : > { %v486_v20 = vadd.f32 %v1721_v40, %v485_v19 }
  0xe8   : > { %v563_v22 = vmax.f32 %v486_v20, 0.0 }
  0xea   : > { %649 = vmatmul.f32.gmra.mxu1 %v563_v22 }
  0xed   : > { %v488_v27 = vpop.f32.mrf.mxu0 }
  0xee   : > { %v489_v28 = vadd.f32 %v1721_v40, %v488_v27 }
  0xf0   : > { %v564_v30 = vmax.f32 %v489_v28, 0.0 }
  0xf2   : > { %652 = vmatmul.f32.gmra.mxu1 %v564_v30 }
  0xf5   : > { %v491_v35 = vpop.f32.mrf.mxu0 }
  0xf6   : > { %v492_v36 = vadd.f32 %v1721_v40, %v491_v35 }
  0xf8   : > { %v565_v38 = vmax.f32 %v492_v36, 0.0 }
  0xfa   : > { %655 = vmatmul.f32.gmra.mxu1 %v565_v38 }
  0xfd   : > { %v494_v43 = vpop.f32.mrf.mxu0 }
  0xfe   : > { %v495_v44 = vadd.f32 %v1721_v40, %v494_v43 }
 0x100   : > { %v566_v46 = vmax.f32 %v495_v44, 0.0 }
 0x102   : > { %658 = vmatmul.f32.gmra.mxu1 %v566_v46  ;;  %v536_v46 = vpop.f32.mrf.mxu3 }
 0x105   : > { %v497_v49 = vpop.f32.mrf.mxu0 }
 0x106   : > { %v498_v50 = vadd.f32 %v1721_v40, %v497_v49 }
 0x108   : > { %v567_v51 = vmax.f32 %v498_v50, 0.0 }
 0x10a   : > { %661 = vmatmul.f32.gmra.mxu1 %v567_v51 }
 0x10d   : > { %v500_v52 = vpop.f32.mrf.mxu0 }
 0x10e   : > { %v501_v53 = vadd.f32 %v1721_v40, %v500_v52  ;;  %v534_v52 = vadd.f32 %v1721_v40, %v533_v37 }
 0x110   : > { %v568_v54 = vmax.f32 %v501_v53, 0.0  ;;  %v579_v53 = vmax.f32 %v534_v52, 0.0 }
 0x112   : > { %664 = vmatmul.f32.gmra.mxu1 %v568_v54 }
 0x115   : > { %v503_v55 = vpop.f32.mrf.mxu0 }
 0x116   : > { %v504_v56 = vadd.f32 %v1721_v40, %v503_v55  ;;  %v539_v55 = vpop.f32.mrf.mxu3 }
 0x118   : > { %v569_v57 = vmax.f32 %v504_v56, 0.0 }
 0x11a   : > { %667 = vmatmul.f32.gmra.mxu1 %v569_v57 }
 0x11d   : > { %v506_v59 = vpop.f32.mrf.mxu0 }
 0x11e   : > { %v507_v60 = vadd.f32 %v1721_v40, %v506_v59  ;;  %v537_v59 = vadd.f32 %v1721_v40, %v536_v46 }
 0x11f   : > { %v623_v61 = vpop.f32.mrf.mxu1 }
 0x120   : > { %v570_v62 = vmax.f32 %v507_v60, 0.0  ;;  %v624_v63 = vadd.f32 %v1822_v58, %v623_v61  ;;  %v580_v60 = vmax.f32 %v537_v59, 0.0 }
 0x122   : > { %v719_v0 = vmax.f32 %v624_v63, 0.0  ;;  %670 = vmatmul.f32.gmra.mxu1 %v570_v62  ;;  %v542_v63 = vpop.f32.mrf.mxu3 }
 0x124   : > { %787 = vmatmul.f32.vlgmr.msra.gmra.mxu2 %v719_v0 }
 0x125   : > { %v509_v1 = vpop.f32.mrf.mxu0 }
 0x126   : > { %v510_v2 = vadd.f32 %v1721_v40, %v509_v1  ;;  %v540_v1 = vadd.f32 %v1721_v40, %v539_v55 }
 0x127   : > { %v626_v3 = vpop.f32.mrf.mxu1 }
 0x128   : > { %v571_v4 = vmax.f32 %v510_v2, 0.0  ;;  %v627_v5 = vadd.f32 %v1822_v58, %v626_v3  ;;  %v581_v2 = vmax.f32 %v540_v1, 0.0 }
 0x12a   : > { %v720_v6 = vmax.f32 %v627_v5, 0.0  ;;  %673 = vmatmul.f32.gmra.mxu1 %v571_v4 }
 0x12c   : > { %790 = vmatmul.f32.gmra.mxu2 %v720_v6  ;;  %v543_v6 = vadd.f32 %v1721_v40, %v542_v63 }
 0x12d   : > { %v512_v7 = vpop.f32.mrf.mxu0 }
 0x12e   : > { %v513_v8 = vadd.f32 %v1721_v40, %v512_v7  ;;  %v545_v7 = vpop.f32.mrf.mxu3 }
 0x12f   : > { %v629_v9 = vpop.f32.mrf.mxu1 }
 0x130   : > { %v572_v10 = vmax.f32 %v513_v8, 0.0  ;;  %v630_v11 = vadd.f32 %v1822_v58, %v629_v9  ;;  %v582_v8 = vmax.f32 %v543_v6, 0.0 }
 0x132   : > { %v721_v12 = vmax.f32 %v630_v11, 0.0  ;;  %676 = vmatmul.f32.gmra.mxu1 %v572_v10 }
 0x134   : > { %793 = vmatmul.f32.gmra.mxu2 %v721_v12  ;;  %v546_v12 = vadd.f32 %v1721_v40, %v545_v7 }
 0x135   : > { %v515_v13 = vpop.f32.mrf.mxu0 }
 0x136   : > { %v516_v14 = vadd.f32 %v1721_v40, %v515_v13  ;;  %v548_v13 = vpop.f32.mrf.mxu3 }
 0x137   : > { %v632_v15 = vpop.f32.mrf.mxu1 }
 0x138   : > { %v573_v16 = vmax.f32 %v516_v14, 0.0  ;;  %v633_v17 = vadd.f32 %v1822_v58, %v632_v15  ;;  %v583_v14 = vmax.f32 %v546_v12, 0.0 }
 0x13a   : > { %v722_v18 = vmax.f32 %v633_v17, 0.0  ;;  %679 = vmatmul.f32.gmra.mxu1 %v573_v16 }
 0x13c   : > { %796 = vmatmul.f32.gmra.mxu2 %v722_v18  ;;  %v549_v18 = vadd.f32 %v1721_v40, %v548_v13 }
 0x13d   : > { %v518_v19 = vpop.f32.mrf.mxu0 }
 0x13e   : > { %v519_v20 = vadd.f32 %v1721_v40, %v518_v19  ;;  %v584_v19 = vmax.f32 %v549_v18, 0.0 }
 0x13f   : > { %v635_v21 = vpop.f32.mrf.mxu1 }
 0x140   : > { %v574_v22 = vmax.f32 %v519_v20, 0.0  ;;  %v636_v23 = vadd.f32 %v1822_v58, %v635_v21  ;;  %v551_v21 = vpop.f32.mrf.mxu3 }
 0x142   : > { %v723_v24 = vmax.f32 %v636_v23, 0.0  ;;  %682 = vmatmul.f32.gmra.mxu1 %v574_v22 }
 0x144   : > { %799 = vmatmul.f32.gmra.mxu2 %v723_v24  ;;  %v552_v24 = vadd.f32 %v1721_v40, %v551_v21 }
 0x145   : > { %v521_v25 = vpop.f32.mrf.mxu0 }
 0x146   : > { %v522_v26 = vadd.f32 %v1721_v40, %v521_v25  ;;  %v585_v25 = vmax.f32 %v552_v24, 0.0 }
 0x147   : > { %v638_v27 = vpop.f32.mrf.mxu1 }
 0x148   : > { %v575_v28 = vmax.f32 %v522_v26, 0.0  ;;  %v639_v29 = vadd.f32 %v1822_v58, %v638_v27 }
 0x14a   : > { %v724_v30 = vmax.f32 %v639_v29, 0.0  ;;  %685 = vmatmul.f32.gmra.mxu1 %v575_v28 }
 0x14c   : > { %802 = vmatmul.f32.gmra.mxu2 %v724_v30 }
 0x14d   : > { %v524_v31 = vpop.f32.mrf.mxu0 }
 0x14e   : > { %v525_v32 = vadd.f32 %v1721_v40, %v524_v31 }
 0x14f   : > { %v641_v33 = vpop.f32.mrf.mxu1 }
 0x150   : > { %v576_v34 = vmax.f32 %v525_v32, 0.0  ;;  %v642_v35 = vadd.f32 %v1822_v58, %v641_v33  ;;  %v1861_v32 = vld [vmem:[%s2124_s6] ss:$0 sm:$0xff] }
 0x152   : > { %v725_v36 = vmax.f32 %v642_v35, 0.0  ;;  %688 = vmatmul.f32.gmra.mxu1 %v576_v34 }
 0x154   : > { %805 = vmatmul.f32.gmra.mxu2 %v725_v36 }
 0x155   : > { %v527_v38 = vpop.f32.mrf.mxu0 }
 0x156   : > { %v528_v39 = vadd.f32 %v1721_v40, %v527_v38 }
 0x157   : > { %v644_v41 = vpop.f32.mrf.mxu1 }
 0x158   : > { %v577_v42 = vmax.f32 %v528_v39, 0.0  ;;  %v645_v43 = vadd.f32 %v1822_v58, %v644_v41 }
 0x15a   : > { %v726_v44 = vmax.f32 %v645_v43, 0.0  ;;  %691 = vmatmul.f32.gmra.mxu1 %v577_v42 }
 0x15c   : > { %808 = vmatmul.f32.gmra.mxu2 %v726_v44 }
 0x15d   : > { %v530_v45 = vpop.f32.mrf.mxu0 }
 0x15e   : > { %v531_v47 = vadd.f32 %v1721_v40, %v530_v45 }
 0x15f   : > { %v647_v48 = vpop.f32.mrf.mxu1 }
 0x160   : > { %v578_v49 = vmax.f32 %v531_v47, 0.0  ;;  %v648_v50 = vadd.f32 %v1822_v58, %v647_v48 }
 0x162   : > { %v727_v51 = vmax.f32 %v648_v50, 0.0  ;;  %694 = vmatmul.f32.vlgmr.msrb.gmra.mxu3 %v578_v49 }
 0x164   : > { %811 = vmatmul.f32.gmra.mxu2 %v727_v51 }
 0x167   : > { %v650_v54 = vpop.f32.mrf.mxu1 }
 0x168   : > { %v651_v56 = vadd.f32 %v1822_v58, %v650_v54 }
 0x16a   : > { %v728_v57 = vmax.f32 %v651_v56, 0.0  ;;  %697 = vmatmul.f32.gmra.mxu3 %v579_v53 }
 0x16c   : > { %814 = vmatmul.f32.gmra.mxu2 %v728_v57 }
 0x16f   : > { %v653_v61 = vpop.f32.mrf.mxu1 }
 0x170   : > { %v654_v62 = vadd.f32 %v1822_v58, %v653_v61 }
 0x172   : > { %v729_v0 = vmax.f32 %v654_v62, 0.0  ;;  %700 = vmatmul.f32.gmra.mxu3 %v580_v60 }
 0x174   : > { %817 = vmatmul.f32.gmra.mxu2 %v729_v0 }
 0x177   : > { %v656_v3 = vpop.f32.mrf.mxu1 }
 0x178   : > { %v657_v4 = vadd.f32 %v1822_v58, %v656_v3 }
 0x17a   : > { %v730_v5 = vmax.f32 %v657_v4, 0.0  ;;  %703 = vmatmul.f32.gmra.mxu3 %v581_v2 }
 0x17c   : > { %820 = vmatmul.f32.gmra.mxu2 %v730_v5 }
 0x17f   : > { %v659_v9 = vpop.f32.mrf.mxu1 }
 0x180   : > { %v660_v10 = vadd.f32 %v1822_v58, %v659_v9 }
 0x182   : > { %v731_v11 = vmax.f32 %v660_v10, 0.0  ;;  %706 = vmatmul.f32.gmra.mxu3 %v582_v8 }
 0x184   : > { %823 = vmatmul.f32.gmra.mxu2 %v731_v11 }
 0x187   : > { %v662_v15 = vpop.f32.mrf.mxu1 }
 0x188   : > { %v663_v16 = vadd.f32 %v1822_v58, %v662_v15 }
 0x18a   : > { %v732_v17 = vmax.f32 %v663_v16, 0.0  ;;  %709 = vmatmul.f32.gmra.mxu3 %v583_v14 }
 0x18c   : > { %826 = vmatmul.f32.gmra.mxu2 %v732_v17 }
 0x18f   : > { %v665_v20 = vpop.f32.mrf.mxu1 }
 0x190   : > { %v666_v22 = vadd.f32 %v1822_v58, %v665_v20 }
 0x192   : > { %v733_v23 = vmax.f32 %v666_v22, 0.0  ;;  %712 = vmatmul.f32.gmra.mxu3 %v584_v19 }
 0x194   : > { %829 = vmatmul.f32.gmra.mxu2 %v733_v23 }
 0x197   : > { %v668_v26 = vpop.f32.mrf.mxu1 }
 0x198   : > { %v669_v27 = vadd.f32 %v1822_v58, %v668_v26 }
 0x19a   : > { %v734_v28 = vmax.f32 %v669_v27, 0.0  ;;  %715 = vmatmul.f32.gmra.mxu3 %v585_v25 }
 0x19c   : > { %832 = vmatmul.f32.gmra.mxu2 %v734_v28 }
 0x19f   : > { %v671_v29 = vpop.f32.mrf.mxu1 }
 0x1a0   : > { %v672_v30 = vadd.f32 %v1822_v58, %v671_v29 }
 0x1a2   : > { %v735_v31 = vmax.f32 %v672_v30, 0.0 }
 0x1a4   : > { %835 = vmatmul.f32.gmra.mxu2 %v735_v31 }
 0x1a7   : > { %v674_v40 = vpop.f32.mrf.mxu1  ;;  %v788_v33 = vpop.f32.mrf.mxu2 }
 0x1a8   : > { %v675_v34 = vadd.f32 %v1822_v58, %v674_v40  ;;  %v789_v35 = vadd.f32 %v1861_v32, %v788_v33 }
 0x1aa   : > { %v736_v36 = vmax.f32 %v675_v34, 0.0  ;;  %885 = vst.msk [vmem:[%s1865_s30] sm:$0xff] %vm884_vm1, %v789_v35 }
 0x1ac   : > { %838 = vmatmul.f32.gmra.mxu2 %v736_v36 }
 0x1af   : > { %v677_v37 = vpop.f32.mrf.mxu1  ;;  %v791_v38 = vpop.f32.mrf.mxu2 }
 0x1b0   : > { %v678_v39 = vadd.f32 %v1822_v58, %v677_v37  ;;  %v792_v41 = vadd.f32 %v1861_v32, %v791_v38 }
 0x1b2   : > { %v737_v42 = vmax.f32 %v678_v39, 0.0  ;;  %886 = vst.msk [vmem:[%s1865_s30 + $0x8] sm:$0xff] %vm884_vm1, %v792_v41 }
 0x1b4   : > { %841 = vmatmul.f32.gmra.mxu2 %v737_v42 }
 0x1b7   : > { %v680_v43 = vpop.f32.mrf.mxu1  ;;  %v794_v44 = vpop.f32.mrf.mxu2 }
 0x1b8   : > { %v681_v45 = vadd.f32 %v1822_v58, %v680_v43  ;;  %v795_v46 = vadd.f32 %v1861_v32, %v794_v44 }
 0x1ba   : > { %v738_v47 = vmax.f32 %v681_v45, 0.0  ;;  %887 = vst.msk [vmem:[%s1865_s30 + $0x10] sm:$0xff] %vm884_vm1, %v795_v46 }
 0x1bc   : > { %844 = vmatmul.f32.gmra.mxu2 %v738_v47 }
 0x1bf   : > { %v683_v48 = vpop.f32.mrf.mxu1  ;;  %v797_v49 = vpop.f32.mrf.mxu2 }
 0x1c0   : > { %v684_v50 = vadd.f32 %v1822_v58, %v683_v48  ;;  %v798_v51 = vadd.f32 %v1861_v32, %v797_v49 }
 0x1c2   : > { %v739_v52 = vmax.f32 %v684_v50, 0.0  ;;  %888 = vst.msk [vmem:[%s1865_s30 + $0x18] sm:$0xff] %vm884_vm1, %v798_v51 }
 0x1c4   : > { %847 = vmatmul.f32.gmra.mxu2 %v739_v52 }
 0x1c7   : > { %v686_v53 = vpop.f32.mrf.mxu1  ;;  %v800_v54 = vpop.f32.mrf.mxu2 }
 0x1c8   : > { %v687_v55 = vadd.f32 %v1822_v58, %v686_v53  ;;  %v801_v56 = vadd.f32 %v1861_v32, %v800_v54 }
 0x1ca   : > { %v740_v57 = vmax.f32 %v687_v55, 0.0  ;;  %889 = vst.msk [vmem:[%s1865_s30 + $0x20] sm:$0xff] %vm884_vm1, %v801_v56 }
 0x1cc   : > { %850 = vmatmul.f32.gmra.mxu2 %v740_v57 }
 0x1cf   : > { %v689_v59 = vpop.f32.mrf.mxu1  ;;  %v803_v60 = vpop.f32.mrf.mxu2 }
 0x1d0   : > { %v690_v61 = vadd.f32 %v1822_v58, %v689_v59  ;;  %v804_v62 = vadd.f32 %v1861_v32, %v803_v60 }
 0x1d2   : > { %v741_v63 = vmax.f32 %v690_v61, 0.0  ;;  %890 = vst.msk [vmem:[%s1865_s30 + $0x28] sm:$0xff] %vm884_vm1, %v804_v62 }
 0x1d4   : > { %853 = vmatmul.f32.gmra.mxu2 %v741_v63 }
 0x1d7   : > { %v692_v0 = vpop.f32.mrf.mxu1  ;;  %v806_v1 = vpop.f32.mrf.mxu2 }
 0x1d8   : > { %v693_v2 = vadd.f32 %v1822_v58, %v692_v0  ;;  %v807_v3 = vadd.f32 %v1861_v32, %v806_v1 }
 0x1da   : > { %v742_v4 = vmax.f32 %v693_v2, 0.0  ;;  %891 = vst.msk [vmem:[%s1865_s30 + $0x30] sm:$0xff] %vm884_vm1, %v807_v3 }
 0x1dc   : > { %856 = vmatmul.f32.gmra.mxu2 %v742_v4 }
 0x1df   : > { %v809_v5 = vpop.f32.mrf.mxu2 }
 0x1e0   : > { %v810_v6 = vadd.f32 %v1861_v32, %v809_v5 }
 0x1e2   : > { %892 = vst.msk [vmem:[%s1865_s30 + $0x38] sm:$0xff] %vm884_vm1, %v810_v6 }
 0x1e5   : > { %v695_v7 = vpop.f32.mrf.mxu3 }
 0x1e6   : > { %v696_v8 = vadd.f32 %v1822_v58, %v695_v7 }
 0x1e7   : > { %v812_v9 = vpop.f32.mrf.mxu2 }
 0x1e8   : > { %v743_v10 = vmax.f32 %v696_v8, 0.0  ;;  %v813_v11 = vadd.f32 %v1861_v32, %v812_v9 }
 0x1ea   : > { %893 = vst.msk [vmem:[%s1865_s30 + $0x40] sm:$0xff] %vm884_vm1, %v813_v11  ;;  %859 = vmatmul.f32.vlgmr.msra.gmra.mxu3 %v743_v10 }
 0x1ed   : > { %v698_v12 = vpop.f32.mrf.mxu3 }
 0x1ee   : > { %v699_v13 = vadd.f32 %v1822_v58, %v698_v12 }
 0x1ef   : > { %v815_v14 = vpop.f32.mrf.mxu2 }
 0x1f0   : > { %v744_v15 = vmax.f32 %v699_v13, 0.0  ;;  %v816_v16 = vadd.f32 %v1861_v32, %v815_v14 }
 0x1f2   : > { %894 = vst.msk [vmem:[%s1865_s30 + $0x48] sm:$0xff] %vm884_vm1, %v816_v16  ;;  %862 = vmatmul.f32.gmra.mxu3 %v744_v15 }
 0x1f5   : > { %v701_v17 = vpop.f32.mrf.mxu3 }
 0x1f6   : > { %v702_v18 = vadd.f32 %v1822_v58, %v701_v17 }
 0x1f7   : > { %v818_v19 = vpop.f32.mrf.mxu2 }
 0x1f8   : > { %v745_v20 = vmax.f32 %v702_v18, 0.0  ;;  %v819_v21 = vadd.f32 %v1861_v32, %v818_v19 }
 0x1fa   : > { %895 = vst.msk [vmem:[%s1865_s30 + $0x50] sm:$0xff] %vm884_vm1, %v819_v21  ;;  %865 = vmatmul.f32.gmra.mxu3 %v745_v20 }
 0x1fd   : > { %v704_v22 = vpop.f32.mrf.mxu3 }
 0x1fe   : > { %v705_v23 = vadd.f32 %v1822_v58, %v704_v22 }
 0x1ff   : > { %v821_v24 = vpop.f32.mrf.mxu2 }
 0x200   : > { %v746_v25 = vmax.f32 %v705_v23, 0.0  ;;  %v822_v26 = vadd.f32 %v1861_v32, %v821_v24 }
 0x202   : > { %896 = vst.msk [vmem:[%s1865_s30 + $0x58] sm:$0xff] %vm884_vm1, %v822_v26  ;;  %868 = vmatmul.f32.gmra.mxu3 %v746_v25 }
 0x205   : > { %v707_v27 = vpop.f32.mrf.mxu3 }
 0x206   : > { %v708_v28 = vadd.f32 %v1822_v58, %v707_v27 }
 0x207   : > { %v824_v29 = vpop.f32.mrf.mxu2 }
 0x208   : > { %v747_v30 = vmax.f32 %v708_v28, 0.0  ;;  %v825_v31 = vadd.f32 %v1861_v32, %v824_v29 }
 0x20a   : > { %897 = vst.msk [vmem:[%s1865_s30 + $0x60] sm:$0xff] %vm884_vm1, %v825_v31  ;;  %871 = vmatmul.f32.gmra.mxu3 %v747_v30 }
 0x20d   : > { %v710_v40 = vpop.f32.mrf.mxu3 }
 0x20e   : > { %v711_v33 = vadd.f32 %v1822_v58, %v710_v40 }
 0x20f   : > { %v827_v34 = vpop.f32.mrf.mxu2 }
 0x210   : > { %v748_v35 = vmax.f32 %v711_v33, 0.0  ;;  %v828_v36 = vadd.f32 %v1861_v32, %v827_v34 }
 0x212   : > { %898 = vst.msk [vmem:[%s1865_s30 + $0x68] sm:$0xff] %vm884_vm1, %v828_v36  ;;  %874 = vmatmul.f32.gmra.mxu3 %v748_v35 }
 0x215   : > { %v713_v37 = vpop.f32.mrf.mxu3 }
 0x216   : > { %v714_v38 = vadd.f32 %v1822_v58, %v713_v37 }
 0x217   : > { %v830_v39 = vpop.f32.mrf.mxu2 }
 0x218   : > { %v749_v41 = vmax.f32 %v714_v38, 0.0  ;;  %v831_v42 = vadd.f32 %v1861_v32, %v830_v39 }
 0x21a   : > { %899 = vst.msk [vmem:[%s1865_s30 + $0x70] sm:$0xff] %vm884_vm1, %v831_v42  ;;  %877 = vmatmul.f32.gmra.mxu3 %v749_v41 }
 0x21d   : > { %v716_v43 = vpop.f32.mrf.mxu3 }
 0x21e   : > { %v717_v44 = vadd.f32 %v1822_v58, %v716_v43 }
 0x21f   : > { %v833_v45 = vpop.f32.mrf.mxu2 }
 0x220   : > { %v750_v46 = vmax.f32 %v717_v44, 0.0  ;;  %v834_v47 = vadd.f32 %v1861_v32, %v833_v45 }
 0x222   : > { %900 = vst.msk [vmem:[%s1865_s30 + $0x78] sm:$0xff] %vm884_vm1, %v834_v47  ;;  %880 = vmatmul.f32.gmra.mxu3 %v750_v46 }
 0x227   : > { %v836_v48 = vpop.f32.mrf.mxu2 }
 0x228   : > { %v837_v49 = vadd.f32 %v1861_v32, %v836_v48 }
 0x22a   : > { %901 = vst.msk [vmem:[%s1865_s30 + $0x80] sm:$0xff] %vm884_vm1, %v837_v49 }
 0x22f   : > { %v839_v50 = vpop.f32.mrf.mxu2 }
 0x230   : > { %v840_v51 = vadd.f32 %v1861_v32, %v839_v50 }
 0x232   : > { %902 = vst.msk [vmem:[%s1865_s30 + $0x88] sm:$0xff] %vm884_vm1, %v840_v51 }
 0x237   : > { %v842_v58 = vpop.f32.mrf.mxu2 }
 0x238   : > { %v843_v52 = vadd.f32 %v1861_v32, %v842_v58 }
 0x23a   : > { %903 = vst.msk [vmem:[%s1865_s30 + $0x90] sm:$0xff] %vm884_vm1, %v843_v52 }
 0x23f   : > { %v845_v53 = vpop.f32.mrf.mxu2 }
 0x240   : > { %v846_v54 = vadd.f32 %v1861_v32, %v845_v53 }
 0x242   : > { %904 = vst.msk [vmem:[%s1865_s30 + $0x98] sm:$0xff] %vm884_vm1, %v846_v54 }
 0x247   : > { %v848_v55 = vpop.f32.mrf.mxu2 }
 0x248   : > { %v849_v56 = vadd.f32 %v1861_v32, %v848_v55 }
 0x24a   : > { %905 = vst.msk [vmem:[%s1865_s30 + $0xa0] sm:$0xff] %vm884_vm1, %v849_v56 }
 0x24f   : > { %v851_v57 = vpop.f32.mrf.mxu2 }
 0x250   : > { %v852_v59 = vadd.f32 %v1861_v32, %v851_v57 }
 0x252   : > { %906 = vst.msk [vmem:[%s1865_s30 + $0xa8] sm:$0xff] %vm884_vm1, %v852_v59 }
 0x257   : > { %v854_v60 = vpop.f32.mrf.mxu2 }
 0x258   : > { %v855_v61 = vadd.f32 %v1861_v32, %v854_v60 }
 0x25a   : > { %907 = vst.msk [vmem:[%s1865_s30 + $0xb0] sm:$0xff] %vm884_vm1, %v855_v61 }
 0x25f   : > { %v857_v62 = vpop.f32.mrf.mxu2 }
 0x260   : > { %v858_v63 = vadd.f32 %v1861_v32, %v857_v62 }
 0x262   : > { %908 = vst.msk [vmem:[%s1865_s30 + $0xb8] sm:$0xff] %vm884_vm1, %v858_v63 }
 0x26d   : > { %v860_v0 = vpop.f32.mrf.mxu3 }
 0x26e   : > { %v861_v1 = vadd.f32 %v1861_v32, %v860_v0 }
 0x270   : > { %909 = vst.msk [vmem:[%s1865_s30 + $0xc0] sm:$0xff] %vm884_vm1, %v861_v1 }
 0x275   : > { %v863_v2 = vpop.f32.mrf.mxu3 }
 0x276   : > { %v864_v3 = vadd.f32 %v1861_v32, %v863_v2 }
 0x278   : > { %910 = vst.msk [vmem:[%s1865_s30 + $0xc8] sm:$0xff] %vm884_vm1, %v864_v3 }
 0x27d   : > { %v866_v4 = vpop.f32.mrf.mxu3 }
 0x27e   : > { %v867_v5 = vadd.f32 %v1861_v32, %v866_v4 }
 0x280   : > { %911 = vst.msk [vmem:[%s1865_s30 + $0xd0] sm:$0xff] %vm884_vm1, %v867_v5 }
 0x285   : > { %v869_v6 = vpop.f32.mrf.mxu3 }
 0x286   : > { %v870_v7 = vadd.f32 %v1861_v32, %v869_v6 }
 0x288   : > { %912 = vst.msk [vmem:[%s1865_s30 + $0xd8] sm:$0xff] %vm884_vm1, %v870_v7 }
 0x28d   : > { %v872_v8 = vpop.f32.mrf.mxu3 }
 0x28e   : > { %v873_v9 = vadd.f32 %v1861_v32, %v872_v8 }
 0x290   : > { %913 = vst.msk [vmem:[%s1865_s30 + $0xe0] sm:$0xff] %vm884_vm1, %v873_v9 }
 0x295   : > { %v875_v10 = vpop.f32.mrf.mxu3 }
 0x296   : > { %v876_v11 = vadd.f32 %v1861_v32, %v875_v10 }
 0x298   : > { %914 = vst.msk [vmem:[%s1865_s30 + $0xe8] sm:$0xff] %vm884_vm1, %v876_v11 }
 0x29d   : > { %v878_v12 = vpop.f32.mrf.mxu3 }
 0x29e   : > { %v879_v13 = vadd.f32 %v1861_v32, %v878_v12 }
 0x2a0   : > { %915 = vst.msk [vmem:[%s1865_s30 + $0xf0] sm:$0xff] %vm884_vm1, %v879_v13 }
 0x2a4   : > { %923 = sbr.rel (!%p1600_p4) target bundleno = 745 (0x2e9), region = 52 }
 0x2a5   : > { %v881_v14 = vpop.f32.mrf.mxu3 }
 0x2a6   : > { %v882_v15 = vadd.f32 %v1861_v32, %v881_v14 }
 0x2a8   : > { %916 = vst.msk [vmem:[%s1865_s30 + $0xf8] sm:$0xff] %vm884_vm1, %v882_v15 }
 0x2a9   : > { %s2136_s24 = smov (!%p926_p8, %s925_s24), 32 }
 0x2aa   : > { %s1298_s16 = sshll.u32 %s2136_s24, 3 }
 0x2ab   : > { %p1301_p9 = scmp.eq.s32.totalorder %s1298_s16, 0 }
 0x2ac   : > { %s1989_s17 = sshrl.u32 (!%p1301_p9), %s2136_s24, 5 }
 0x2ad   : > { %934 = sbr.rel (%p1301_p9) target bundleno = 745 (0x2e9), region = 56  ;;  %p1302_p10 = scmp.le.s32.totalorder (!%p1301_p9), %s1989_s17, 0 }
 0x2b2   : > { %1213 = sbr.rel (%p1302_p10) target bundleno = 728 (0x2d8), region = 132  ;;  %s2127_s27 = smov (!%p1302_p10), %s1983_s15 }
 0x2b3   : > { %s2128_s9 = smov (!%p1302_p10), %s1865_s30  ;;  %s1998_s14 = smov (!%p1302_p10), 0  }
 0x2b4   : > { %s2000_s18 = smov (!%p1302_p10), 0  }
 0x2b7 LB: >> { %v1059_v32 = vld [vmem:[%s1509_s9] sm:$0xff]  ;;  %v1061_v16 = vld [vmem:[%s1509_s9 + $0x8] sm:$0xff]  ;;  %v1063_v17 = vld [vmem:[%s1509_s9 + $0x10] sm:$0xff]  ;;  %s1123_s19 = sadd.s32 1, %s1513_s14  ;;  %s1053_s18 = sadd.s32 1, %s1517_s18   ;;  %s1517_s18 = sphi %s2000_s18, %s1053_s18   ;;  %s1513_s14 = sphi %s1998_s14, %s2131_s14   ;;  %s1509_s9 = sphi %s2128_s9, %s2130_s9   ;;  %s1505_s27 = sphi %s2127_s27, %s2129_s27  }
 0x2b8   : >> { %1060 = vst [vmem:[%s1505_s27] sm:$0xff] %v1059_v32  ;;  %v1065_v18 = vld [vmem:[%s1509_s9 + $0x18] sm:$0xff]  ;;  %p1124_p11 = scmp.ge.s32.totalorder %s1123_s19, %s1989_s17  ;;  %v1067_v19 = vld [vmem:[%s1509_s9 + $0x20] sm:$0xff]  ;;  %v1069_v20 = vld [vmem:[%s1509_s9 + $0x28] sm:$0xff]  ;;  %p1052_p12 = scmp.ge.s32.totalorder %s1053_s18, %s1989_s17 }
 0x2b9   : >> { %1062 = vst [vmem:[%s1505_s27 + $0x8] sm:$0xff] %v1061_v16  ;;  %v1071_v21 = vld [vmem:[%s1509_s9 + $0x30] sm:$0xff]  ;;  %v1073_v22 = vld [vmem:[%s1509_s9 + $0x38] sm:$0xff]  ;;  %v1075_v23 = vld [vmem:[%s1509_s9 + $0x40] sm:$0xff] }
 0x2ba   : >> { %1064 = vst [vmem:[%s1505_s27 + $0x10] sm:$0xff] %v1063_v17  ;;  %s2138_s19 = smov (%p1124_p11, %s1123_s19), 0  ;;  %v1077_v24 = vld [vmem:[%s1509_s9 + $0x48] sm:$0xff]  ;;  %v1079_v25 = vld [vmem:[%s1509_s9 + $0x50] sm:$0xff]  ;;  %v1081_v26 = vld [vmem:[%s1509_s9 + $0x58] sm:$0xff] }
 0x2bb   : >> { %1066 = vst [vmem:[%s1505_s27 + $0x18] sm:$0xff] %v1065_v18  ;;  %s1303_s20 = sshll.u32 %s2138_s19, 8  ;;  %v1083_v27 = vld [vmem:[%s1509_s9 + $0x60] sm:$0xff]  ;;  %v1085_v28 = vld [vmem:[%s1509_s9 + $0x68] sm:$0xff]  ;;  %v1087_v29 = vld [vmem:[%s1509_s9 + $0x70] sm:$0xff]  ;;  %s2131_s14 = smov %s2138_s19 }
 0x2bc   : >> { %1068 = vst [vmem:[%s1505_s27 + $0x20] sm:$0xff] %v1067_v19  ;;  %s2032_s21 = scalar_lea.vmem %s1865_s30, %s1303_s20 [#allocation2]   ;;  %s2035_s22 = scalar_lea.vmem %s1983_s15, %s1303_s20   ;;  %v1089_v30 = vld [vmem:[%s1509_s9 + $0x78] sm:$0xff]  ;;  %v1091_v31 = vld [vmem:[%s1509_s9 + $0x80] sm:$0xff]  ;;  %v1093_v40 = vld [vmem:[%s1509_s9 + $0x88] sm:$0xff] }
 0x2bd   : >> { %1070 = vst [vmem:[%s1505_s27 + $0x28] sm:$0xff] %v1069_v20  ;;  %v1095_v33 = vld [vmem:[%s1509_s9 + $0x90] sm:$0xff]  ;;  %v1097_v34 = vld [vmem:[%s1509_s9 + $0x98] sm:$0xff]  ;;  %v1099_v35 = vld [vmem:[%s1509_s9 + $0xa0] sm:$0xff] }
 0x2be   : >> { %1072 = vst [vmem:[%s1505_s27 + $0x30] sm:$0xff] %v1071_v21  ;;  %v1101_v36 = vld [vmem:[%s1509_s9 + $0xa8] sm:$0xff]  ;;  %v1103_v37 = vld [vmem:[%s1509_s9 + $0xb0] sm:$0xff]  ;;  %v1105_v38 = vld [vmem:[%s1509_s9 + $0xb8] sm:$0xff] }
 0x2bf   : >> { %1074 = vst [vmem:[%s1505_s27 + $0x38] sm:$0xff] %v1073_v22  ;;  %v1107_v39 = vld [vmem:[%s1509_s9 + $0xc0] sm:$0xff]  ;;  %v1109_v41 = vld [vmem:[%s1509_s9 + $0xc8] sm:$0xff]  ;;  %v1111_v42 = vld [vmem:[%s1509_s9 + $0xd0] sm:$0xff] }
 0x2c0   : >> { %1076 = vst [vmem:[%s1505_s27 + $0x40] sm:$0xff] %v1075_v23  ;;  %v1113_v43 = vld [vmem:[%s1509_s9 + $0xd8] sm:$0xff]  ;;  %v1115_v44 = vld [vmem:[%s1509_s9 + $0xe0] sm:$0xff]  ;;  %v1117_v45 = vld [vmem:[%s1509_s9 + $0xe8] sm:$0xff] }
 0x2c1   : >> { %1078 = vst [vmem:[%s1505_s27 + $0x48] sm:$0xff] %v1077_v24  ;;  %v1119_v46 = vld [vmem:[%s1509_s9 + $0xf0] sm:$0xff]  ;;  %v1121_v47 = vld [vmem:[%s1509_s9 + $0xf8] sm:$0xff]  ;;  %s2130_s9 = smov %s2032_s21 }
 0x2c2   : >> { %1080 = vst [vmem:[%s1505_s27 + $0x50] sm:$0xff] %v1079_v25 }
 0x2c3   : >> { %1082 = vst [vmem:[%s1505_s27 + $0x58] sm:$0xff] %v1081_v26 }
 0x2c4   : >> { %1084 = vst [vmem:[%s1505_s27 + $0x60] sm:$0xff] %v1083_v27 }
 0x2c5   : >> { %1086 = vst [vmem:[%s1505_s27 + $0x68] sm:$0xff] %v1085_v28 }
 0x2c6   : >> { %1088 = vst [vmem:[%s1505_s27 + $0x70] sm:$0xff] %v1087_v29 }
 0x2c7   : >> { %1090 = vst [vmem:[%s1505_s27 + $0x78] sm:$0xff] %v1089_v30 }
 0x2c8   : >> { %1092 = vst [vmem:[%s1505_s27 + $0x80] sm:$0xff] %v1091_v31 }
 0x2c9   : >> { %1094 = vst [vmem:[%s1505_s27 + $0x88] sm:$0xff] %v1093_v40 }
 0x2ca   : >> { %1096 = vst [vmem:[%s1505_s27 + $0x90] sm:$0xff] %v1095_v33 }
 0x2cb   : >> { %1098 = vst [vmem:[%s1505_s27 + $0x98] sm:$0xff] %v1097_v34 }
 0x2cc   : >> { %1100 = vst [vmem:[%s1505_s27 + $0xa0] sm:$0xff] %v1099_v35 }
 0x2cd   : >> { %1102 = vst [vmem:[%s1505_s27 + $0xa8] sm:$0xff] %v1101_v36 }
 0x2ce   : >> { %1104 = vst [vmem:[%s1505_s27 + $0xb0] sm:$0xff] %v1103_v37 }
 0x2cf   : >> { %1106 = vst [vmem:[%s1505_s27 + $0xb8] sm:$0xff] %v1105_v38 }
 0x2d0   : >> { %1108 = vst [vmem:[%s1505_s27 + $0xc0] sm:$0xff] %v1107_v39 }
 0x2d1   : >> { %1110 = vst [vmem:[%s1505_s27 + $0xc8] sm:$0xff] %v1109_v41 }
 0x2d2   : >> { %1112 = vst [vmem:[%s1505_s27 + $0xd0] sm:$0xff] %v1111_v42 }
 0x2d3   : >> { %1114 = vst [vmem:[%s1505_s27 + $0xd8] sm:$0xff] %v1113_v43  ;;  %1055 = sbr.rel (!%p1052_p12) target bundleno = 695 (0x2b7), region = 138 }
 0x2d4   : >> { %1116 = vst [vmem:[%s1505_s27 + $0xe0] sm:$0xff] %v1115_v44 }
 0x2d5   : >> { %1118 = vst [vmem:[%s1505_s27 + $0xe8] sm:$0xff] %v1117_v45 }
 0x2d6   : >> { %1120 = vst [vmem:[%s1505_s27 + $0xf0] sm:$0xff] %v1119_v46 }
 0x2d7   : >> { %1122 = vst [vmem:[%s1505_s27 + $0xf8] sm:$0xff] %v1121_v47  ;;  %s2129_s27 = smov %s2035_s22 }
 0x2d8 PF: > { %s2100_s12 = sand.u32 31, %s2136_s24   ;;  %s1314_s23 = sshll.u32 %s1989_s17, 8 }
 0x2d9   : > { %s1134_s26 = scalar_lea.vmem %s1865_s30, %s1314_s23 [#allocation2]   ;;  %s1136_s29 = scalar_lea.vmem %s1983_s15, %s1314_s23  }
 0x2da   : > { %p1308_p13 = scmp.le.s32.totalorder %s2100_s12, 0 }
 0x2db   : > { %s1519_s10 = smov (!%p1308_p13), %s1136_s29   ;;  %s1523_s11 = smov (!%p1308_p13), %s1134_s26  }
 0x2dc   : > { %1227 = sbr.rel (%p1308_p13) target bundleno = 745 (0x2e9), region = 143  ;;  %s1527_s13 = smov (!%p1308_p13), 0  }
 0x2dd   : > { %s1531_s16 = smov (!%p1308_p13), 0  }
 0x2e1 LB: >> { %v1146_v48 = vld [vmem:[%s1525_s11] sm:$0xff]  ;;  %s1148_s24 = sadd.s32 1, %s1529_s13  ;;  %s1140_s16 = sadd.s32 1, %s1533_s16   ;;  %s1533_s16 = sphi %s1531_s16, %s1140_s16   ;;  %s1529_s13 = sphi %s1527_s13, %s1528_s13   ;;  %s1525_s11 = sphi %s1523_s11, %s1153_s11   ;;  %s1521_s10 = sphi %s1519_s10, %s1154_s10  }
 0x2e2   : >> { %1147 = vst [vmem:[%s1521_s10] sm:$0xff] %v1146_v48  ;;  %p1149_p0 = scmp.ge.s32.totalorder %s1148_s24, %s2100_s12  ;;  %p1139_p1 = scmp.ge.s32.totalorder %s1140_s16, %s2100_s12 }
 0x2e4   : >> { %s2140_s24 = smov (%p1149_p0, %s1148_s24), 0  ;;  %1142 = sbr.rel (!%p1139_p1) target bundleno = 737 (0x2e1), region = 149 }
 0x2e5   : >> { %s1309_s30 = sshll.u32 %s2140_s24, 3  ;;  %s1528_s13 = smov %s2140_s24  }
 0x2e6   : >> { %s1153_s11 = scalar_lea.vmem %s1134_s26, %s1309_s30 [#allocation2]   ;;  %s1154_s10 = scalar_lea.vmem %s1136_s29, %s1309_s30  }
 0x2e9 PF: > { %p14_p2 = scmp.ge.s32.totalorder %s1590_s28, 4   ;;  %s2132_s24 = smov %s1497_s25 }
 0x2ea   : > { %s2133_s25 = smov %s1598_s8  ;;  %s2134_s26 = smov %s1590_s28 }
 0x2eb   :  { %16 = sbr.rel (!%p14_p2) target bundleno = 2 (0x2), region = 160 }

</bundles_post_ra>
